<compile_context>
chip_gen: v6e
topology: v6e:2x2x1
jax: 0.10.0
libtpu: 0.0.40
codegen_flags: <defaults>
</compile_context>

<pallas_src>
import jax
import jax.numpy as jnp
from jax import lax
from jax.experimental import pallas as pl
from jax.experimental.pallas import tpu as pltpu


def _round_up(x: int, m: int) -> int:
    return ((x + m - 1) // m) * m


def pair_loss_kernel(n_ref, logits_ref, target_ref, out_ref):
    # n_ref      : (1,)       int32, SMEM (scalar prefetch) -- true row count N
    # logits_ref : (TILE_N,C) input dtype, VMEM
    # target_ref : (TILE_N,1) int32,       VMEM
    # out_ref    : (1,8,128)  float32,     VMEM (per-tile partial loss sum,
    #                                            broadcast across the tile)
    i = pl.program_id(0)
    x = logits_ref[...]                       # native dtype; no full f32 copy
    t = target_ref[...]                       # (tn, 1) int32
    tn, c = x.shape

    # --- 1) gather logits[i, target[i]] first (bounds live range of the int32
    #        iota tile so it is never concurrently live with the f32 exp tile).
    #        Exactly one nonzero per row -> native-dtype row-sum is exact.
    cls_id = lax.broadcasted_iota(jnp.int32, (tn, c), 1)            # (tn, C)
    picked = jnp.sum(jnp.where(cls_id == t, x, jnp.zeros_like(x)),
                     axis=1, keepdims=True).astype(jnp.float32)     # (tn, 1)

    # --- 2) numerically-stable log-sum-exp per row; accumulate in f32.
    m = jnp.max(x, axis=1, keepdims=True)                           # (tn, 1)
    ex = jnp.exp((x - m).astype(jnp.float32))                       # (tn, C) f32
    lse = m.astype(jnp.float32) + jnp.log(
        jnp.sum(ex, axis=1, keepdims=True))                         # (tn, 1) f32

    per_example = lse - picked                                      # (tn, 1)

    # mask rows past N (partial last tile); select discards NaN/Inf padding
    n_total = n_ref[0]
    row_id = i * tn + lax.broadcasted_iota(jnp.int32, (tn, 1), 0)
    per_example = jnp.where(row_id < n_total, per_example, 0.0)

    out_ref[...] = jnp.broadcast_to(jnp.sum(per_example), out_ref.shape)


def _make_logits_spec(tile_n: int, c: int, buffers: int) -> pl.BlockSpec:
    idx = lambda i, n_ref: (i, 0)
    if buffers > 2:
        try:
            return pl.BlockSpec((tile_n, c), idx,
                                pipeline_mode=pl.Buffered(buffers))
        except Exception:
            pass  # older API: fall back to default 2-deep buffering
    return pl.BlockSpec((tile_n, c), idx)


def pair_loss(logits: jax.Array, target: jax.Array) -> jax.Array:
    """Mean cross-entropy loss (PyTorch CrossEntropyLoss semantics)."""
    n, c = logits.shape
    itemsize = logits.dtype.itemsize

    # ---- per-generation VMEM-aware block sizing -----------------------------
    try:
        vmem_cap = int(pltpu.get_tpu_info().vmem_capacity_bytes)
    except Exception:
        vmem_cap = 64 * 1024 * 1024          # conservative (v7x-sized) fallback

    big_vmem = vmem_cap >= 96 * 1024 * 1024  # v5e/v6e: 128 MiB; v7x: 64 MiB
    budget = (80 if big_vmem else 44) * 1024 * 1024      # scoped VMEM we allow
    target_block = (12 if big_vmem else 10) * 1024 * 1024
    buffers = 3 if big_vmem else 2           # deeper buffering is free on 128 MiB

    bytes_per_row = max(1, c * itemsize)
    # peak per-element bytes: `buffers` streamed copies of the block +
    # ~12 B/elem of in-body temporaries ((x-m)/exp f32 pass; the iota pass is
    # not concurrently live after the reorder above).
    per_row_total = max(1, c * (buffers * itemsize + 12))

    rows_target = max(512, target_block // bytes_per_row)
    rows_cap = max(8, budget // per_row_total)
    tile_n = max(8, (min(rows_target, rows_cap) // 8) * 8)

    if n <= 8:
        tile_n = n                                # full-dim block, always legal
    else:
        tile_n = min(tile_n, (n // 8) * 8)        # keep multiple-of-8 rows

    num_tiles = -(-n // tile_n)
    # give both v7x TensorCores work when the whole problem fits in one tile
    if num_tiles == 1 and tile_n >= 16:
        tile_n = _round_up((n + 1) // 2, 8)
        num_tiles = -(-n // tile_n)

    vmem_limit = min(vmem_cap - 8 * 1024 * 1024, budget + 8 * 1024 * 1024)

    t2 = target.astype(jnp.int32).reshape(n, 1)
    n_scalar = jnp.full((1,), n, dtype=jnp.int32)

    cost = pl.CostEstimate(
        flops=5 * n * c,
        transcendentals=n * c,
        bytes_accessed=n * c * itemsize + n * 4 + num_tiles * 8 * 128 * 4,
    )

    partials = pl.pallas_call(
        pair_loss_kernel,
        out_shape=jax.ShapeDtypeStruct((num_tiles, 8, 128), jnp.float32),
        grid_spec=pltpu.PrefetchScalarGridSpec(
            num_scalar_prefetch=1,
            grid=(num_tiles,),
            in_specs=[
                _make_logits_spec(tile_n, c, buffers),
                pl.BlockSpec((tile_n, 1), lambda i, n_ref: (i, 0)),
            ],
            out_specs=pl.BlockSpec((1, 8, 128), lambda i, n_ref: (i, 0, 0)),
        ),
        compiler_params=pltpu.CompilerParams(
            dimension_semantics=("parallel",),
            vmem_limit_bytes=int(vmem_limit),
        ),
        cost_estimate=cost,
    )(n_scalar, logits, t2)

    # finish the mean on a handful of scalars (free) with the true N
    return jnp.sum(partials[:, 0, 0]) / jnp.float32(n)


def pair_loss_ref(logits: jax.Array, target: jax.Array) -> jax.Array:
    # pure-JAX reference (PyTorch CrossEntropyLoss, reduction="mean")
    logp = jax.nn.log_softmax(logits.astype(jnp.float32), axis=-1)
    picked = jnp.take_along_axis(logp, target.astype(jnp.int32)[:, None], axis=1)[:, 0]
    return -jnp.mean(picked)


# TODO(synk): PyTorch's hard error on out-of-range targets and `ignore_index`
# support are not replicated (invalid targets silently contribute picked=0).

if __name__ == "__main__":
    key = jax.random.PRNGKey(0)
    k1, k2, k3 = jax.random.split(key, 3)

    # contrastive-style square logits (C == batch), matching PairLoss usage
    N1, C1 = 8, 8
    logits1 = jax.random.normal(k1, (N1, C1), dtype=jnp.float32)
    target1 = jnp.arange(N1, dtype=jnp.int32)

    # ragged shapes (N % 8 != 0, C % 128 != 0) to exercise the masked last tile
    N2, C2 = 20, 40
    logits2 = jax.random.normal(k2, (N2, C2), dtype=jnp.float32)
    target2 = jax.random.randint(k3, (N2,), 0, C2, dtype=jnp.int32)

    for lg, tg in ((logits1, target1), (logits2, target2)):
        out = jax.block_until_ready(pair_loss(lg, tg))
        ref = jax.block_until_ready(pair_loss_ref(lg, tg))
        assert jnp.allclose(out, ref, rtol=1e-5, atol=1e-5), (out, ref)

    print("KERNEL_OK")
</pallas_src>

<mosaic_0001>
module attributes {stable_mosaic.version = 11 : i64} {
  func.func @pair_loss_kernel(%arg0: i32, %arg1: memref<1xi32, #tpu.memory_space<smem>>, %arg2: memref<8x8xf32, #tpu.memory_space<vmem>>, %arg3: memref<8x1xi32, #tpu.memory_space<vmem>>, %arg4: memref<1x8x128xf32, #tpu.memory_space<vmem>>) attributes {dimension_semantics = [#tpu.dimension_semantics<parallel>], iteration_bounds = array<i64: 1>, scalar_prefetch = 1 : i64, scratch_operands = 0 : i64, tpu.core_type = #tpu.core_type<tc>, window_params = [{transform_indices = @transform_0, window_bounds = array<i64: 8, 8>}, {transform_indices = @transform_1, window_bounds = array<i64: 8, 1>}, {transform_indices = @transform_2, window_bounds = array<i64: 1, 8, 128>}]} {
    %c0 = arith.constant 0 : index
    %c0_0 = arith.constant 0 : index
    %0 = vector.load %arg2[%c0, %c0_0] : memref<8x8xf32, #tpu.memory_space<vmem>>, vector<8x8xf32>
    %c0_1 = arith.constant 0 : index
    %c0_2 = arith.constant 0 : index
    %1 = vector.load %arg3[%c0_1, %c0_2] : memref<8x1xi32, #tpu.memory_space<vmem>>, vector<8x1xi32>
    %2 = tpu.iota {dimensions = array<i32: 1>} : vector<8x8xi32>
    %3 = vector.broadcast %1 : vector<8x1xi32> to vector<8x8xi32>
    %4 = arith.cmpi eq, %2, %3 : vector<8x8xi32>
    %cst = arith.constant 0.000000e+00 : f32
    %5 = vector.broadcast %cst : f32 to vector<8x8xf32>
    %6 = arith.select %4, %0, %5 : vector<8x8xi1>, vector<8x8xf32>
    %cst_3 = arith.constant dense<0.000000e+00> : vector<8xf32>
    %7 = vector.multi_reduction <add>, %6, %cst_3 [1] : vector<8x8xf32> to vector<8xf32>
    %8 = vector.shape_cast %7 : vector<8xf32> to vector<8x1xf32>
    %cst_4 = arith.constant dense<0xFF800000> : vector<8xf32>
    %9 = vector.multi_reduction <maximumf>, %0, %cst_4 [1] : vector<8x8xf32> to vector<8xf32>
    %10 = vector.shape_cast %9 : vector<8xf32> to vector<8x1xf32>
    %11 = vector.broadcast %10 : vector<8x1xf32> to vector<8x8xf32>
    %12 = arith.subf %0, %11 : vector<8x8xf32>
    %13 = math.exp %12 : vector<8x8xf32>
    %cst_5 = arith.constant dense<0.000000e+00> : vector<8xf32>
    %14 = vector.multi_reduction <add>, %13, %cst_5 [1] : vector<8x8xf32> to vector<8xf32>
    %15 = vector.shape_cast %14 : vector<8xf32> to vector<8x1xf32>
    %16 = math.log %15 : vector<8x1xf32>
    %17 = arith.addf %10, %16 : vector<8x1xf32>
    %18 = arith.subf %17, %8 : vector<8x1xf32>
    %c0_6 = arith.constant 0 : index
    %19 = memref.load %arg1[%c0_6] : memref<1xi32, #tpu.memory_space<smem>>
    %c8_i32 = arith.constant 8 : i32
    %20 = arith.muli %arg0, %c8_i32 : i32
    %21 = tpu.iota {dimensions = array<i32: 0>} : vector<8x1xi32>
    %22 = vector.broadcast %20 : i32 to vector<8x1xi32>
    %23 = arith.addi %22, %21 : vector<8x1xi32>
    %24 = vector.broadcast %19 : i32 to vector<8x1xi32>
    %25 = arith.cmpi slt, %23, %24 : vector<8x1xi32>
    %cst_7 = arith.constant 0.000000e+00 : f32
    %26 = vector.broadcast %cst_7 : f32 to vector<8x1xf32>
    %27 = arith.select %25, %18, %26 : vector<8x1xi1>, vector<8x1xf32>
    %28 = vector.shape_cast %27 : vector<8x1xf32> to vector<1x8x1xf32>
    %cst_8 = arith.constant dense<0.000000e+00> : vector<1xf32>
    %29 = vector.multi_reduction <add>, %28, %cst_8 [1, 2] : vector<1x8x1xf32> to vector<1xf32>
    %30 = vector.shape_cast %29 : vector<1xf32> to vector<1x1x1xf32>
    %31 = vector.extract %30[0, 0, 0] : f32 from vector<1x1x1xf32>
    %32 = vector.broadcast %31 : f32 to vector<1x8x128xf32>
    %c0_9 = arith.constant 0 : index
    %c0_10 = arith.constant 0 : index
    %c0_11 = arith.constant 0 : index
    %33 = vector.load %arg4[%c0_9, %c0_10, %c0_11] : memref<1x8x128xf32, #tpu.memory_space<vmem>>, vector<1x8x128xf32>
    tpu.vector_store %arg4[%c0_9, %c0_10, %c0_11], %32 {strides = array<i32>} : memref<1x8x128xf32, #tpu.memory_space<vmem>>, vector<1x8x128xf32>,
    return
  }
  func.func @transform_0(%arg0: i32, %arg1: memref<1xi32, #tpu.memory_space<smem>>) -> (i32, i32) {
    %c0_i32 = arith.constant 0 : i32
    %c0_i32_0 = arith.constant 0 : i32
    return %arg0, %c0_i32 : i32, i32
  }
  func.func @transform_1(%arg0: i32, %arg1: memref<1xi32, #tpu.memory_space<smem>>) -> (i32, i32) {
    %c0_i32 = arith.constant 0 : i32
    %c0_i32_0 = arith.constant 0 : i32
    return %arg0, %c0_i32 : i32, i32
  }
  func.func @transform_2(%arg0: i32, %arg1: memref<1xi32, #tpu.memory_space<smem>>) -> (i32, i32, i32) {
    %c0_i32 = arith.constant 0 : i32
    %c0_i32_0 = arith.constant 0 : i32
    %c0_i32_1 = arith.constant 0 : i32
    return %arg0, %c0_i32, %c0_i32_0 : i32, i32, i32
  }
}

</mosaic_0001>

<bundles_post_ra>
// kernel: tpu_custom_call.1
= control target key start
LH: loop header
LB: loop body
LE: loop exit
PB: predicated region body
PF: predicated region fallthrough
CT: control target
= control target key end

     0   :  { %vm23_vm0 = vcmask 64512   ;;  %s144_s0 = inlined_call_operand.<no memory space> [shape: s32[1], index: 0, kind: input, shape index: {}]   ;;  %s145_s1 = inlined_call_operand.vmem [shape: f32[8,8], index: 1, kind: input, shape index: {}]   ;;  %s146_s2 = inlined_call_operand.vmem [shape: s32[8,1], index: 2, kind: input, shape index: {}]   ;;  %s147_s3 = inlined_call_operand.hbm [shape: f32[1,8,128], index: 3, kind: output, shape index: {}]  }
   0x1   :  { %v14_v0 = vld [vmem:[%s145_s1] sm:$0xff] }
   0x2   :  { %9 = vsyncpa [#allocation5], 0  ;;  %v27_v1 = vsel %vm23_vm0, %v14_v0, -inf  ;;  %v107_v2 = vmov 0   ;;  %v15_v3 = vld [vmem:[%s146_s2] sm:$0xff]  ;;  %v16_v7 = vlaneseq  ;;  %v46_v18 = vstv %s144_s0  ;;  %s108_s16 = smov [#allocation4]  }
   0x3   :  { %80 = vset.pattern.permute.xlu0 %v107_v2  ;;  %vm49_vm3 = vcmask 7168   ;;  %s68_s17 = sshll.u32 %s108_s16, 4  ;;  %s69_s17 = int_to_ptr.vmem [resolvable:$true] %s68_s17 }
   0x4   :  { %28 = vmax.xlane.f32.xlu0 %v27_v1  ;;  %v17_v8 = vand.u32 127, %v16_v7  ;;  %v43_v16 = vshrl.u32 %v16_v7, 7  ;;  %s85_s0 = scalar_lea.vmem %s69_s17, 128  ;;  %p90_p1 = scmp.lt.s32.totalorder %s69_s17, %s69_s17 }
   0x5   :  { %p86_p0 = scmp.ne.s32.totalorder %s69_s17, %s85_s0  ;;  %p91_p2 = scmp.lt.s32.totalorder %s85_s0, %s85_s0 }
   0x6   :  { %vm47_vm2 = vcmp.lt.s32.totalorder %v43_v16, %v46_v18 }
   0x7   :  { %p92_p3 = por %p91_p2, %p90_p1 }
   0x9   :  { %p93_p4 = pnand %p92_p3, %p86_p0 }
  0x1a   :  { %19 = vperm.xlu0 %80, %v15_v3  }
  0x8d   :  { %v29_v4 = vpop.xlane.xlu0 %28 }
  0x8e   :  { %v30_v5 = vsub.f32 %v14_v0, %v29_v4 }
  0x90   :  { %v31_v6 = vmul.f32 1.442695, %v30_v5 }
  0x92   :  { %81 = vpow2.f32 %v31_v6 }
  0x95   :  { %v20_v9 = vpop.permute.xlu0 %19 }
  0x96   :  { %vm21_vm1 = vcmp.eq.s32.totalorder %v17_v8, %v20_v9 }
  0x97   :  { %v22_v11 = vsel %vm21_vm1, %v14_v0, 0.0 }
  0x98   :  { %v24_v13 = vsel %vm23_vm0, %v22_v11, 0.0 }
  0x9f   :  { %v82_v10 = vpop.eup %81 }
  0xa0   :  { %v33_v12 = vsel %vm23_vm0, %v82_v10, 0.0 }
  0xa1   :  { %34 = vadd.xlane.f32.xlu1 %v33_v12 }
  0xa5   :  { %25 = vadd.xlane.f32.xlu1 %v24_v13 }
 0x12a   :  { %v35_v14 = vpop.xlane.xlu1 %34 }
 0x12b   :  { %83 = vlog2.f32 %v35_v14 }
 0x12e   :  { %v26_v19 = vpop.xlane.xlu1 %25 }
 0x138   :  { %v84_v15 = vpop.eup %83 }
 0x139   :  { %v37_v17 = vmul.f32 0.6931472, %v84_v15 }
 0x13b   :  { %v38_v20 = vadd.f32 %v37_v17, %v29_v4 }
 0x13d   :  { %v39_v21 = vsub.f32 %v38_v20, %v26_v19 }
 0x13f   :  { %v48_v22 = vsel %vm47_vm2, %v39_v21, 0.0 }
 0x140   :  { %v50_v23 = vsel %vm49_vm3, %v48_v22, 0.0 }
 0x141   :  { %51 = vadd.xlane.f32.xlu1 %v50_v23 }
 0x1ca   :  { %v52_v24 = vpop.xlane.xlu1 %51 }
 0x1cb   :  { %v53_v25 = vrot.slane %v52_v24, 4 }
 0x1cd   :  { %v54_v26 = vadd.f32 %v53_v25, %v52_v24 }
 0x1cf   :  { %v55_v27 = vrot.slane %v54_v26, 2 }
 0x1d1   :  { %v56_v28 = vadd.f32 %v55_v27, %v54_v26 }
 0x1d3   :  { %v57_v29 = vrot.slane %v56_v28, 1 }
 0x1d5   :  { %v58_v30 = vadd.f32 %v57_v29, %v56_v28 }
 0x1d7   :  { %76 = vpush %v58_v30 }
 0x208   :  { %s77_s18 = spop %76 }
 0x209   :  { %v60_v31 = vstv %s77_s18 }
 0x20a   :  { %61 = vst [vmem:[#allocation4] sm:$0xff] %v60_v31 }
 0x20b   :  { %96 = shalt.err (!%p93_p4)
}
 0x20c   :  { %71 = dma.vmem_to_hbm [thread:$0]  %s69_s17, 128, %s147_s3, [#allocation5]  }
 0x20d   :  { %105 = dma.done.wait [#allocation5], 128  }
 0x20e   :  { %106 = vsyncadd [#allocation5], 4294967168 }
 0x20f   :  { %75 = vsyncpa [#allocation5], 1 }

</bundles_post_ra>
